<compile_context>
chip_gen: v7x
topology: tpu7x:2x2x1
jax: 0.10.0
libtpu: 0.0.40
codegen_flags: <defaults>
</compile_context>

<pallas_src>
import jax
import jax.numpy as jnp
from jax.experimental import pallas as pl
from jax.experimental.pallas import tpu as pltpu

# ---------------------------------------------------------------------------
# Model dimensions (small, consistent with the module structure)
# ---------------------------------------------------------------------------
BATCH = 8
INPUT_DIM = 64          # stands in for 768
COG_DIM = 32            # stands in for 256 (divisible by num_heads=8)
META_LAYERS = 3
SCORER_H1 = 128
SCORER_H2 = 64
LN_EPS = 1e-5
OUT_COLS = 128          # lane-dense output slab: [emb(32) | constraint(32) | score(64 bcast)]

# --- packed weight buffer (bf16) row offsets (all multiples of 16) ---------
W0_R, W1_R, W2_R = 0, 64, 96
WEFF_R, TW2_R, WHEADS_R, SW2_R = 128, 160, 224, 256
W_ROWS, W_COLS = 384, 160

# --- packed bias/LN buffer (f32, pre-broadcast to BATCH sublanes) ----------
B0_R, G0_R, E0_R = 0, 8, 16
B1_R, G1_R, E1_R = 24, 32, 40
B2_R, G2_R, E2_R = 48, 56, 64
BEFF_R, TB2_R, BHEADS_R, SB2_R = 72, 80, 88, 96
SW3_R, SB3_R = 104, 112
B_ROWS, B_COLS = 120, 160


def _layernorm(y, gamma, beta):
    mu = jnp.mean(y, axis=-1, keepdims=True)
    var = jnp.mean((y - mu) ** 2, axis=-1, keepdims=True)
    return (y - mu) * jax.lax.rsqrt(var + LN_EPS) * gamma + beta


def cognitive_kernel(x_ref, w_ref, b_ref, o_ref):
    f32 = jnp.float32

    def dot(a, w):
        # bf16 x bf16 -> native MXU path, f32 accumulation.
        return jnp.dot(a.astype(jnp.bfloat16), w, preferred_element_type=f32)

    h = x_ref[...]                                                 # (B, 64) f32

    # --- cognitive encoder: 3 x (Linear -> LayerNorm -> ReLU -> Dropout(id)) --
    for (wr, nr, br, gr, er) in ((W0_R, INPUT_DIM, B0_R, G0_R, E0_R),
                                 (W1_R, COG_DIM, B1_R, G1_R, E1_R),
                                 (W2_R, COG_DIM, B2_R, G2_R, E2_R)):
        y = dot(h, w_ref[wr:wr + nr, 0:COG_DIM]) + b_ref[br:br + BATCH, 0:COG_DIM]
        y = _layernorm(y, b_ref[gr:gr + BATCH, 0:COG_DIM],
                       b_ref[er:er + BATCH, 0:COG_DIM])
        h = jnp.maximum(y, 0.0)

    # --- MHA (seq_len=1 => out_proj(V)) fused with 1st transformer Linear ----
    t = jnp.maximum(
        dot(h, w_ref[WEFF_R:WEFF_R + COG_DIM, 0:2 * COG_DIM])
        + b_ref[BEFF_R:BEFF_R + BATCH, 0:2 * COG_DIM], 0.0)        # (B, 64)
    t = jnp.tanh(
        dot(t, w_ref[TW2_R:TW2_R + 2 * COG_DIM, 0:COG_DIM])
        + b_ref[TB2_R:TB2_R + BATCH, 0:COG_DIM])                   # (B, 32) = emb

    # --- heads: [scorer L1 (128) | constraint (32)] in one (32,160) matmul ---
    heads = (dot(t, w_ref[WHEADS_R:WHEADS_R + COG_DIM, 0:SCORER_H1 + COG_DIM])
             + b_ref[BHEADS_R:BHEADS_R + BATCH, 0:SCORER_H1 + COG_DIM])
    s = jnp.maximum(heads[:, 0:SCORER_H1], 0.0)
    constraint = jax.nn.sigmoid(heads[:, SCORER_H1:SCORER_H1 + COG_DIM])

    s = jnp.maximum(
        dot(s, w_ref[SW2_R:SW2_R + SCORER_H1, 0:SCORER_H2])
        + b_ref[SB2_R:SB2_R + BATCH, 0:SCORER_H2], 0.0)            # (B, 64)

    # --- final 64 -> 1: VPU multiply + cross-lane reduce (no N=1 MXU pass) ---
    score = jax.nn.sigmoid(
        jnp.sum(s * b_ref[SW3_R:SW3_R + BATCH, 0:SCORER_H2], axis=-1, keepdims=True)
        + b_ref[SB3_R:SB3_R + BATCH, 0:1])                         # (B, 1)

    # --- single lane-dense (B, 128) output store ------------------------------
    o_ref[...] = jnp.concatenate(
        [t, constraint, jnp.broadcast_to(score, (BATCH, 2 * COG_DIM))], axis=-1)


# ---------------------------------------------------------------------------
# Parameters: synthetic init + packing into two VMEM buffers
# ---------------------------------------------------------------------------
def init_params(key):
    """Deterministic synthetic parameters (biases / LN params kept 2-D (1, N))."""
    ks = iter(jax.random.split(key, 64))
    nrm = lambda shp, scale=0.05: (scale * jax.random.normal(next(ks), shp)
                                   ).astype(jnp.float32)
    p = {}
    enc = []
    in_dim = INPUT_DIM
    for _ in range(META_LAYERS):
        enc.append((
            nrm((in_dim, COG_DIM)),                 # Linear weight (in, out)
            nrm((1, COG_DIM)),                      # Linear bias
            jnp.ones((1, COG_DIM), jnp.float32),    # LayerNorm gamma
            jnp.zeros((1, COG_DIM), jnp.float32),   # LayerNorm beta
        ))
        in_dim = COG_DIM
    p["enc"] = enc
    # MHA value / output projections (only ones that matter at seq_len=1)
    p["wv"], p["bv"] = nrm((COG_DIM, COG_DIM)), nrm((1, COG_DIM))
    p["wo"], p["bo"] = nrm((COG_DIM, COG_DIM)), nrm((1, COG_DIM))
    # cognitive_state_transformer
    p["tw1"], p["tb1"] = nrm((COG_DIM, 2 * COG_DIM)), nrm((1, 2 * COG_DIM))
    p["tw2"], p["tb2"] = nrm((2 * COG_DIM, COG_DIM)), nrm((1, COG_DIM))
    # self_improvement_constraint
    p["cw"], p["cb"] = nrm((COG_DIM, COG_DIM)), nrm((1, COG_DIM))
    # cognitive_complexity_scorer
    p["sw1"], p["sb1"] = nrm((COG_DIM, SCORER_H1)), nrm((1, SCORER_H1))
    p["sw2"], p["sb2"] = nrm((SCORER_H1, SCORER_H2)), nrm((1, SCORER_H2))
    p["sw3"], p["sb3"] = nrm((SCORER_H2, 1)), nrm((1, 1))
    return p


def pack_params(p):
    """Fuse + pack all parameters into one bf16 weight buffer and one f32 bias
    buffer (done once, outside the per-call jit)."""
    f32, bf16 = jnp.float32, jnp.bfloat16

    # Fold attention (softmax==1 -> out_proj(V)) into the first transformer Linear.
    w_eff = p["wv"] @ p["wo"] @ p["tw1"]                                # (32, 64)
    b_eff = (p["bv"] @ p["wo"] + p["bo"]) @ p["tw1"] + p["tb1"]         # (1, 64)
    # Concatenate independent heads that share input t: [scorer L1 | constraint].
    w_heads = jnp.concatenate([p["sw1"], p["cw"]], axis=1)              # (32, 160)
    b_heads = jnp.concatenate([p["sb1"], p["cb"]], axis=1)              # (1, 160)

    (w0, b0, g0, e0), (w1, b1, g1, e1), (w2, b2, g2, e2) = p["enc"]

    wbuf = jnp.zeros((W_ROWS, W_COLS), bf16)

    def put_w(buf, row, w):
        r, c = w.shape
        return buf.at[row:row + r, 0:c].set(w.astype(bf16))

    for row, w in ((W0_R, w0), (W1_R, w1), (W2_R, w2), (WEFF_R, w_eff),
                   (TW2_R, p["tw2"]), (WHEADS_R, w_heads), (SW2_R, p["sw2"])):
        wbuf = put_w(wbuf, row, w)

    bbuf = jnp.zeros((B_ROWS, B_COLS), f32)

    def put_b(buf, row, v):
        c = v.shape[-1]
        return buf.at[row:row + BATCH, 0:c].set(
            jnp.broadcast_to(v.reshape(1, c).astype(f32), (BATCH, c)))

    for row, v in ((B0_R, b0), (G0_R, g0), (E0_R, e0),
                   (B1_R, b1), (G1_R, g1), (E1_R, e1),
                   (B2_R, b2), (G2_R, g2), (E2_R, e2),
                   (BEFF_R, b_eff), (TB2_R, p["tb2"]),
                   (BHEADS_R, b_heads), (SB2_R, p["sb2"]),
                   (SW3_R, p["sw3"].T), (SB3_R, p["sb3"])):
        bbuf = put_b(bbuf, row, v)

    return wbuf, bbuf


# ---------------------------------------------------------------------------
# Pallas entry point
# ---------------------------------------------------------------------------
@jax.jit
def cognitive_forward(x, w_buf, b_buf):
    """Single-invocation Pallas kernel (no grid): everything fits in VMEM."""
    vmem = pl.BlockSpec(memory_space=pltpu.MemorySpace.VMEM)
    flops = 2 * BATCH * (INPUT_DIM * COG_DIM + 2 * COG_DIM * COG_DIM
                         + COG_DIM * 2 * COG_DIM + 2 * COG_DIM * COG_DIM
                         + COG_DIM * (SCORER_H1 + COG_DIM)
                         + SCORER_H1 * SCORER_H2 + SCORER_H2)
    bytes_accessed = (x.size * 4 + w_buf.size * 2 + b_buf.size * 4
                      + BATCH * OUT_COLS * 4)
    slab = pl.pallas_call(
        cognitive_kernel,
        out_shape=jax.ShapeDtypeStruct((BATCH, OUT_COLS), jnp.float32),
        in_specs=[vmem, vmem, vmem],
        out_specs=vmem,
        cost_estimate=pl.CostEstimate(
            flops=flops,
            transcendentals=BATCH * (3 + 2 * COG_DIM + 1),
            bytes_accessed=bytes_accessed),
    )(x, w_buf, b_buf)
    emb = slab[:, 0:COG_DIM]
    constraint = slab[:, COG_DIM:2 * COG_DIM]
    score = slab[:, 2 * COG_DIM:2 * COG_DIM + 1]
    return emb, constraint, score


# ---------------------------------------------------------------------------
# References for correctness checking
# ---------------------------------------------------------------------------
def reference_forward_f32(x, p):
    """Original (unfused) module semantics in plain f32 JAX."""
    h = x
    for (w, b, g, e) in p["enc"]:
        y = h @ w + b
        mu = y.mean(-1, keepdims=True)
        var = ((y - mu) ** 2).mean(-1, keepdims=True)
        y = (y - mu) / jnp.sqrt(var + LN_EPS) * g + e
        h = jnp.maximum(y, 0.0)
    v = h @ p["wv"] + p["bv"]
    a = v @ p["wo"] + p["bo"]
    t = jnp.maximum(a @ p["tw1"] + p["tb1"], 0.0)
    t = jnp.tanh(t @ p["tw2"] + p["tb2"])
    c = jax.nn.sigmoid(t @ p["cw"] + p["cb"])
    s = jnp.maximum(t @ p["sw1"] + p["sb1"], 0.0)
    s = jnp.maximum(s @ p["sw2"] + p["sb2"], 0.0)
    s = jax.nn.sigmoid(s @ p["sw3"] + p["sb3"])
    return t, c, s


def reference_forward_packed(x, w_buf, b_buf):
    """Mirrors the kernel's fused / bf16-weight math in plain JAX (tight check)."""
    f32 = jnp.float32
    W = lambda r, n, c: w_buf[r:r + n, 0:c].astype(f32)
    Bv = lambda r, c: b_buf[r:r + BATCH, 0:c]
    dot = lambda a, w: jnp.dot(a.astype(jnp.bfloat16).astype(f32), w)

    h = x
    for (wr, nr, br, gr, er) in ((W0_R, INPUT_DIM, B0_R, G0_R, E0_R),
                                 (W1_R, COG_DIM, B1_R, G1_R, E1_R),
                                 (W2_R, COG_DIM, B2_R, G2_R, E2_R)):
        y = dot(h, W(wr, nr, COG_DIM)) + Bv(br, COG_DIM)
        mu = y.mean(-1, keepdims=True)
        var = ((y - mu) ** 2).mean(-1, keepdims=True)
        y = (y - mu) * jax.lax.rsqrt(var + LN_EPS) * Bv(gr, COG_DIM) + Bv(er, COG_DIM)
        h = jnp.maximum(y, 0.0)
    t = jnp.maximum(dot(h, W(WEFF_R, COG_DIM, 2 * COG_DIM))
                    + Bv(BEFF_R, 2 * COG_DIM), 0.0)
    t = jnp.tanh(dot(t, W(TW2_R, 2 * COG_DIM, COG_DIM)) + Bv(TB2_R, COG_DIM))
    heads = (dot(t, W(WHEADS_R, COG_DIM, SCORER_H1 + COG_DIM))
             + Bv(BHEADS_R, SCORER_H1 + COG_DIM))
    s = jnp.maximum(heads[:, 0:SCORER_H1], 0.0)
    c = jax.nn.sigmoid(heads[:, SCORER_H1:SCORER_H1 + COG_DIM])
    s = jnp.maximum(dot(s, W(SW2_R, SCORER_H1, SCORER_H2)) + Bv(SB2_R, SCORER_H2), 0.0)
    sc = jax.nn.sigmoid(jnp.sum(s * Bv(SW3_R, SCORER_H2), -1, keepdims=True)
                        + Bv(SB3_R, 1))
    return t, c, sc


if __name__ == "__main__":
    key = jax.random.PRNGKey(0)
    k_x, k_p = jax.random.split(key)
    x = jax.random.normal(k_x, (BATCH, INPUT_DIM), dtype=jnp.float32)
    params = init_params(k_p)
    w_buf, b_buf = pack_params(params)

    emb, constraint, score = cognitive_forward(x, w_buf, b_buf)
    jax.block_until_ready((emb, constraint, score))

    assert emb.shape == (BATCH, COG_DIM)
    assert constraint.shape == (BATCH, COG_DIM)
    assert score.shape == (BATCH, 1)

    # Tight check against a reference that mirrors the kernel's bf16 math.
    p_emb, p_con, p_sc = reference_forward_packed(x, w_buf, b_buf)
    assert jnp.allclose(emb, p_emb, atol=5e-4, rtol=5e-4)
    assert jnp.allclose(constraint, p_con, atol=5e-4, rtol=5e-4)
    assert jnp.allclose(score, p_sc, atol=5e-4, rtol=5e-4)

    # Loose check against the original full-f32 module semantics
    # (bounded outputs => bf16 weight rounding stays well under this tolerance).
    r_emb, r_con, r_sc = reference_forward_f32(x, params)
    assert jnp.allclose(emb, r_emb, atol=5e-2, rtol=5e-2)
    assert jnp.allclose(constraint, r_con, atol=5e-2, rtol=5e-2)
    assert jnp.allclose(score, r_sc, atol=5e-2, rtol=5e-2)

    print("KERNEL_OK")
</pallas_src>

<mosaic_0001>
module attributes {stable_mosaic.version = 11 : i64} {
  func.func @cognitive_kernel(%arg0: memref<8x64xf32, #tpu.memory_space<vmem>>, %arg1: memref<384x160xbf16, #tpu.memory_space<vmem>>, %arg2: memref<120x160xf32, #tpu.memory_space<vmem>>, %arg3: memref<8x128xf32, #tpu.memory_space<vmem>>) attributes {dimension_semantics = [], scalar_prefetch = 0 : i64, scratch_operands = 0 : i64, tpu.core_type = #tpu.core_type<tc>} {
    %c0 = arith.constant 0 : index
    %c0_0 = arith.constant 0 : index
    %0 = vector.load %arg0[%c0, %c0_0] : memref<8x64xf32, #tpu.memory_space<vmem>>, vector<8x64xf32>
    %c0_1 = arith.constant 0 : index
    %c0_2 = arith.constant 0 : index
    %1 = vector.load %arg1[%c0_1, %c0_2] : memref<384x160xbf16, #tpu.memory_space<vmem>>, vector<64x32xbf16>
    %2 = arith.truncf %0 : vector<8x64xf32> to vector<8x64xbf16>
    %cst = arith.constant dense<0.000000e+00> : vector<8x32xf32>
    %3 = tpu.matmul %2, %1, %cst {dimension_numbers = #tpu.dot_dimension_numbers<[1], [0], [0], [1], [0, 0, 1, 1], [], []>} : vector<8x64xbf16>, vector<64x32xbf16>, vector<8x32xf32> -> vector<8x32xf32>
    %c0_3 = arith.constant 0 : index
    %c0_4 = arith.constant 0 : index
    %4 = vector.load %arg2[%c0_3, %c0_4] : memref<120x160xf32, #tpu.memory_space<vmem>>, vector<8x32xf32>
    %5 = arith.addf %3, %4 : vector<8x32xf32>
    %c8 = arith.constant 8 : index
    %c0_5 = arith.constant 0 : index
    %6 = vector.load %arg2[%c8, %c0_5] : memref<120x160xf32, #tpu.memory_space<vmem>>, vector<8x32xf32>
    %c16 = arith.constant 16 : index
    %c0_6 = arith.constant 0 : index
    %7 = vector.load %arg2[%c16, %c0_6] : memref<120x160xf32, #tpu.memory_space<vmem>>, vector<8x32xf32>
    %cst_7 = arith.constant dense<0.000000e+00> : vector<8xf32>
    %8 = vector.multi_reduction <add>, %5, %cst_7 [1] : vector<8x32xf32> to vector<8xf32>
    %9 = vector.shape_cast %8 : vector<8xf32> to vector<8x1xf32>
    %cst_8 = arith.constant 3.200000e+01 : f32
    %10 = vector.broadcast %cst_8 : f32 to vector<8x1xf32>
    %11 = arith.divf %9, %10 : vector<8x1xf32>
    %12 = vector.broadcast %11 : vector<8x1xf32> to vector<8x32xf32>
    %13 = arith.subf %5, %12 : vector<8x32xf32>
    %14 = arith.mulf %13, %13 : vector<8x32xf32>
    %cst_9 = arith.constant dense<0.000000e+00> : vector<8xf32>
    %15 = vector.multi_reduction <add>, %14, %cst_9 [1] : vector<8x32xf32> to vector<8xf32>
    %16 = vector.shape_cast %15 : vector<8xf32> to vector<8x1xf32>
    %cst_10 = arith.constant 3.200000e+01 : f32
    %17 = vector.broadcast %cst_10 : f32 to vector<8x1xf32>
    %18 = arith.divf %16, %17 : vector<8x1xf32>
    %19 = vector.broadcast %11 : vector<8x1xf32> to vector<8x32xf32>
    %20 = arith.subf %5, %19 : vector<8x32xf32>
    %cst_11 = arith.constant 9.99999974E-6 : f32
    %21 = vector.broadcast %cst_11 : f32 to vector<8x1xf32>
    %22 = arith.addf %18, %21 : vector<8x1xf32>
    %23 = math.rsqrt %22 : vector<8x1xf32>
    %24 = vector.broadcast %23 : vector<8x1xf32> to vector<8x32xf32>
    %25 = arith.mulf %20, %24 : vector<8x32xf32>
    %26 = arith.mulf %25, %6 : vector<8x32xf32>
    %27 = arith.addf %26, %7 : vector<8x32xf32>
    %cst_12 = arith.constant 0.000000e+00 : f32
    %28 = vector.broadcast %cst_12 : f32 to vector<8x32xf32>
    %29 = arith.maximumf %27, %28 : vector<8x32xf32>
    %c64 = arith.constant 64 : index
    %c0_13 = arith.constant 0 : index
    %30 = vector.load %arg1[%c64, %c0_13] : memref<384x160xbf16, #tpu.memory_space<vmem>>, vector<32x32xbf16>
    %31 = arith.truncf %29 : vector<8x32xf32> to vector<8x32xbf16>
    %cst_14 = arith.constant dense<0.000000e+00> : vector<8x32xf32>
    %32 = tpu.matmul %31, %30, %cst_14 {dimension_numbers = #tpu.dot_dimension_numbers<[1], [0], [0], [1], [0, 0, 1, 1], [], []>} : vector<8x32xbf16>, vector<32x32xbf16>, vector<8x32xf32> -> vector<8x32xf32>
    %c24 = arith.constant 24 : index
    %c0_15 = arith.constant 0 : index
    %33 = vector.load %arg2[%c24, %c0_15] : memref<120x160xf32, #tpu.memory_space<vmem>>, vector<8x32xf32>
    %34 = arith.addf %32, %33 : vector<8x32xf32>
    %c32 = arith.constant 32 : index
    %c0_16 = arith.constant 0 : index
    %35 = vector.load %arg2[%c32, %c0_16] : memref<120x160xf32, #tpu.memory_space<vmem>>, vector<8x32xf32>
    %c40 = arith.constant 40 : index
    %c0_17 = arith.constant 0 : index
    %36 = vector.load %arg2[%c40, %c0_17] : memref<120x160xf32, #tpu.memory_space<vmem>>, vector<8x32xf32>
    %cst_18 = arith.constant dense<0.000000e+00> : vector<8xf32>
    %37 = vector.multi_reduction <add>, %34, %cst_18 [1] : vector<8x32xf32> to vector<8xf32>
    %38 = vector.shape_cast %37 : vector<8xf32> to vector<8x1xf32>
    %cst_19 = arith.constant 3.200000e+01 : f32
    %39 = vector.broadcast %cst_19 : f32 to vector<8x1xf32>
    %40 = arith.divf %38, %39 : vector<8x1xf32>
    %41 = vector.broadcast %40 : vector<8x1xf32> to vector<8x32xf32>
    %42 = arith.subf %34, %41 : vector<8x32xf32>
    %43 = arith.mulf %42, %42 : vector<8x32xf32>
    %cst_20 = arith.constant dense<0.000000e+00> : vector<8xf32>
    %44 = vector.multi_reduction <add>, %43, %cst_20 [1] : vector<8x32xf32> to vector<8xf32>
    %45 = vector.shape_cast %44 : vector<8xf32> to vector<8x1xf32>
    %cst_21 = arith.constant 3.200000e+01 : f32
    %46 = vector.broadcast %cst_21 : f32 to vector<8x1xf32>
    %47 = arith.divf %45, %46 : vector<8x1xf32>
    %48 = vector.broadcast %40 : vector<8x1xf32> to vector<8x32xf32>
    %49 = arith.subf %34, %48 : vector<8x32xf32>
    %cst_22 = arith.constant 9.99999974E-6 : f32
    %50 = vector.broadcast %cst_22 : f32 to vector<8x1xf32>
    %51 = arith.addf %47, %50 : vector<8x1xf32>
    %52 = math.rsqrt %51 : vector<8x1xf32>
    %53 = vector.broadcast %52 : vector<8x1xf32> to vector<8x32xf32>
    %54 = arith.mulf %49, %53 : vector<8x32xf32>
    %55 = arith.mulf %54, %35 : vector<8x32xf32>
    %56 = arith.addf %55, %36 : vector<8x32xf32>
    %cst_23 = arith.constant 0.000000e+00 : f32
    %57 = vector.broadcast %cst_23 : f32 to vector<8x32xf32>
    %58 = arith.maximumf %56, %57 : vector<8x32xf32>
    %c96 = arith.constant 96 : index
    %c0_24 = arith.constant 0 : index
    %59 = vector.load %arg1[%c96, %c0_24] : memref<384x160xbf16, #tpu.memory_space<vmem>>, vector<32x32xbf16>
    %60 = arith.truncf %58 : vector<8x32xf32> to vector<8x32xbf16>
    %cst_25 = arith.constant dense<0.000000e+00> : vector<8x32xf32>
    %61 = tpu.matmul %60, %59, %cst_25 {dimension_numbers = #tpu.dot_dimension_numbers<[1], [0], [0], [1], [0, 0, 1, 1], [], []>} : vector<8x32xbf16>, vector<32x32xbf16>, vector<8x32xf32> -> vector<8x32xf32>
    %c48 = arith.constant 48 : index
    %c0_26 = arith.constant 0 : index
    %62 = vector.load %arg2[%c48, %c0_26] : memref<120x160xf32, #tpu.memory_space<vmem>>, vector<8x32xf32>
    %63 = arith.addf %61, %62 : vector<8x32xf32>
    %c56 = arith.constant 56 : index
    %c0_27 = arith.constant 0 : index
    %64 = vector.load %arg2[%c56, %c0_27] : memref<120x160xf32, #tpu.memory_space<vmem>>, vector<8x32xf32>
    %c64_28 = arith.constant 64 : index
    %c0_29 = arith.constant 0 : index
    %65 = vector.load %arg2[%c64_28, %c0_29] : memref<120x160xf32, #tpu.memory_space<vmem>>, vector<8x32xf32>
    %cst_30 = arith.constant dense<0.000000e+00> : vector<8xf32>
    %66 = vector.multi_reduction <add>, %63, %cst_30 [1] : vector<8x32xf32> to vector<8xf32>
    %67 = vector.shape_cast %66 : vector<8xf32> to vector<8x1xf32>
    %cst_31 = arith.constant 3.200000e+01 : f32
    %68 = vector.broadcast %cst_31 : f32 to vector<8x1xf32>
    %69 = arith.divf %67, %68 : vector<8x1xf32>
    %70 = vector.broadcast %69 : vector<8x1xf32> to vector<8x32xf32>
    %71 = arith.subf %63, %70 : vector<8x32xf32>
    %72 = arith.mulf %71, %71 : vector<8x32xf32>
    %cst_32 = arith.constant dense<0.000000e+00> : vector<8xf32>
    %73 = vector.multi_reduction <add>, %72, %cst_32 [1] : vector<8x32xf32> to vector<8xf32>
    %74 = vector.shape_cast %73 : vector<8xf32> to vector<8x1xf32>
    %cst_33 = arith.constant 3.200000e+01 : f32
    %75 = vector.broadcast %cst_33 : f32 to vector<8x1xf32>
    %76 = arith.divf %74, %75 : vector<8x1xf32>
    %77 = vector.broadcast %69 : vector<8x1xf32> to vector<8x32xf32>
    %78 = arith.subf %63, %77 : vector<8x32xf32>
    %cst_34 = arith.constant 9.99999974E-6 : f32
    %79 = vector.broadcast %cst_34 : f32 to vector<8x1xf32>
    %80 = arith.addf %76, %79 : vector<8x1xf32>
    %81 = math.rsqrt %80 : vector<8x1xf32>
    %82 = vector.broadcast %81 : vector<8x1xf32> to vector<8x32xf32>
    %83 = arith.mulf %78, %82 : vector<8x32xf32>
    %84 = arith.mulf %83, %64 : vector<8x32xf32>
    %85 = arith.addf %84, %65 : vector<8x32xf32>
    %cst_35 = arith.constant 0.000000e+00 : f32
    %86 = vector.broadcast %cst_35 : f32 to vector<8x32xf32>
    %87 = arith.maximumf %85, %86 : vector<8x32xf32>
    %c128 = arith.constant 128 : index
    %c0_36 = arith.constant 0 : index
    %88 = vector.load %arg1[%c128, %c0_36] : memref<384x160xbf16, #tpu.memory_space<vmem>>, vector<32x64xbf16>
    %89 = arith.truncf %87 : vector<8x32xf32> to vector<8x32xbf16>
    %cst_37 = arith.constant dense<0.000000e+00> : vector<8x64xf32>
    %90 = tpu.matmul %89, %88, %cst_37 {dimension_numbers = #tpu.dot_dimension_numbers<[1], [0], [0], [1], [0, 0, 1, 1], [], []>} : vector<8x32xbf16>, vector<32x64xbf16>, vector<8x64xf32> -> vector<8x64xf32>
    %c72 = arith.constant 72 : index
    %c0_38 = arith.constant 0 : index
    %91 = vector.load %arg2[%c72, %c0_38] : memref<120x160xf32, #tpu.memory_space<vmem>>, vector<8x64xf32>
    %92 = arith.addf %90, %91 : vector<8x64xf32>
    %cst_39 = arith.constant 0.000000e+00 : f32
    %93 = vector.broadcast %cst_39 : f32 to vector<8x64xf32>
    %94 = arith.maximumf %92, %93 : vector<8x64xf32>
    %c160 = arith.constant 160 : index
    %c0_40 = arith.constant 0 : index
    %95 = vector.load %arg1[%c160, %c0_40] : memref<384x160xbf16, #tpu.memory_space<vmem>>, vector<64x32xbf16>
    %96 = arith.truncf %94 : vector<8x64xf32> to vector<8x64xbf16>
    %cst_41 = arith.constant dense<0.000000e+00> : vector<8x32xf32>
    %97 = tpu.matmul %96, %95, %cst_41 {dimension_numbers = #tpu.dot_dimension_numbers<[1], [0], [0], [1], [0, 0, 1, 1], [], []>} : vector<8x64xbf16>, vector<64x32xbf16>, vector<8x32xf32> -> vector<8x32xf32>
    %c80 = arith.constant 80 : index
    %c0_42 = arith.constant 0 : index
    %98 = vector.load %arg2[%c80, %c0_42] : memref<120x160xf32, #tpu.memory_space<vmem>>, vector<8x32xf32>
    %99 = arith.addf %97, %98 : vector<8x32xf32>
    %100 = math.tanh %99 : vector<8x32xf32>
    %c224 = arith.constant 224 : index
    %c0_43 = arith.constant 0 : index
    %101 = vector.load %arg1[%c224, %c0_43] : memref<384x160xbf16, #tpu.memory_space<vmem>>, vector<32x160xbf16>
    %102 = arith.truncf %100 : vector<8x32xf32> to vector<8x32xbf16>
    %cst_44 = arith.constant dense<0.000000e+00> : vector<8x160xf32>
    %103 = tpu.matmul %102, %101, %cst_44 {dimension_numbers = #tpu.dot_dimension_numbers<[1], [0], [0], [1], [0, 0, 1, 1], [], []>} : vector<8x32xbf16>, vector<32x160xbf16>, vector<8x160xf32> -> vector<8x160xf32>
    %c88 = arith.constant 88 : index
    %c0_45 = arith.constant 0 : index
    %104 = vector.load %arg2[%c88, %c0_45] : memref<120x160xf32, #tpu.memory_space<vmem>>, vector<8x160xf32>
    %105 = arith.addf %103, %104 : vector<8x160xf32>
    %106 = vector.extract_strided_slice %105 {offsets = [0, 0], sizes = [8, 128], strides = [1, 1]} : vector<8x160xf32> to vector<8x128xf32>
    %cst_46 = arith.constant 0.000000e+00 : f32
    %107 = vector.broadcast %cst_46 : f32 to vector<8x128xf32>
    %108 = arith.maximumf %106, %107 : vector<8x128xf32>
    %109 = vector.extract_strided_slice %105 {offsets = [0, 128], sizes = [8, 32], strides = [1, 1]} : vector<8x160xf32> to vector<8x32xf32>
    %110 = arith.negf %109 : vector<8x32xf32>
    %111 = math.exp %110 : vector<8x32xf32>
    %cst_47 = arith.constant 1.000000e+00 : f32
    %112 = vector.broadcast %cst_47 : f32 to vector<8x32xf32>
    %113 = arith.addf %112, %111 : vector<8x32xf32>
    %114 = arith.divf %112, %113 : vector<8x32xf32>
    %c256 = arith.constant 256 : index
    %c0_48 = arith.constant 0 : index
    %115 = vector.load %arg1[%c256, %c0_48] : memref<384x160xbf16, #tpu.memory_space<vmem>>, vector<128x64xbf16>
    %116 = arith.truncf %108 : vector<8x128xf32> to vector<8x128xbf16>
    %cst_49 = arith.constant dense<0.000000e+00> : vector<8x64xf32>
    %117 = tpu.matmul %116, %115, %cst_49 {dimension_numbers = #tpu.dot_dimension_numbers<[1], [0], [0], [1], [0, 0, 1, 1], [], []>} : vector<8x128xbf16>, vector<128x64xbf16>, vector<8x64xf32> -> vector<8x64xf32>
    %c96_50 = arith.constant 96 : index
    %c0_51 = arith.constant 0 : index
    %118 = vector.load %arg2[%c96_50, %c0_51] : memref<120x160xf32, #tpu.memory_space<vmem>>, vector<8x64xf32>
    %119 = arith.addf %117, %118 : vector<8x64xf32>
    %cst_52 = arith.constant 0.000000e+00 : f32
    %120 = vector.broadcast %cst_52 : f32 to vector<8x64xf32>
    %121 = arith.maximumf %119, %120 : vector<8x64xf32>
    %c104 = arith.constant 104 : index
    %c0_53 = arith.constant 0 : index
    %122 = vector.load %arg2[%c104, %c0_53] : memref<120x160xf32, #tpu.memory_space<vmem>>, vector<8x64xf32>
    %123 = arith.mulf %121, %122 : vector<8x64xf32>
    %cst_54 = arith.constant dense<0.000000e+00> : vector<8xf32>
    %124 = vector.multi_reduction <add>, %123, %cst_54 [1] : vector<8x64xf32> to vector<8xf32>
    %125 = vector.shape_cast %124 : vector<8xf32> to vector<8x1xf32>
    %c112 = arith.constant 112 : index
    %c0_55 = arith.constant 0 : index
    %126 = vector.load %arg2[%c112, %c0_55] : memref<120x160xf32, #tpu.memory_space<vmem>>, vector<8x1xf32>
    %127 = arith.addf %125, %126 : vector<8x1xf32>
    %128 = arith.negf %127 : vector<8x1xf32>
    %129 = math.exp %128 : vector<8x1xf32>
    %cst_56 = arith.constant 1.000000e+00 : f32
    %130 = vector.broadcast %cst_56 : f32 to vector<8x1xf32>
    %131 = arith.addf %130, %129 : vector<8x1xf32>
    %132 = arith.divf %130, %131 : vector<8x1xf32>
    %133 = vector.shape_cast %132 : vector<8x1xf32> to vector<8x1xf32>
    %134 = vector.broadcast %133 : vector<8x1xf32> to vector<8x64xf32>
    %135 = tpu.concatenate %100, %114, %134 in 1 : vector<8x32xf32>, vector<8x32xf32>, vector<8x64xf32> -> vector<8x128xf32>
    %c0_57 = arith.constant 0 : index
    %c0_58 = arith.constant 0 : index
    %136 = vector.load %arg3[%c0_57, %c0_58] : memref<8x128xf32, #tpu.memory_space<vmem>>, vector<8x128xf32>
    tpu.vector_store %arg3[%c0_57, %c0_58], %135 {strides = array<i32>} : memref<8x128xf32, #tpu.memory_space<vmem>>, vector<8x128xf32>,
    return
  }
}

</mosaic_0001>

<bundles_post_ra>
// kernel: cognitive_forward.1
= control target key start
LH: loop header
LB: loop body
LE: loop exit
PB: predicated region body
PF: predicated region fallthrough
CT: control target
= control target key end

     0   :  { %v806_v0 = vmov 0.0   ;;  %vm807_vm0 = vmmov 0   ;;  %vm50_vm1 = vcmask 523264   ;;  %vm96_vm2 = vcmask 261120   ;;  %s809_s11 = smov 32   ;;  %s1016_s1 = inlined_call_operand.vmem [shape: bf16[384,160], index: 1, kind: input, shape index: {}]   ;;  %s1017_s0 = inlined_call_operand.vmem [shape: f32[8,64], index: 0, kind: input, shape index: {}]   ;;  %s1018_s2 = inlined_call_operand.vmem [shape: f32[120,160], index: 2, kind: input, shape index: {}]   ;;  %s1019_s3 = inlined_call_operand.vmem [shape: f32[8,128], index: 3, kind: output, shape index: {}]  }
   0x1   :  { %688 = vmatprep.subr.bf16.mxu1 %v806_v0  ;;  %v762_v1 = vld [vmem:[%s1016_s1] ss:$8 sps:$4 sm:$0xff]   ;;  %696 = vmatprep.mubr.msk.bf16.mxu1 %vm807_vm0, %v806_v0  ;;  %v763_v2 = vld [vmem:[%s1016_s1 + $0x10] ss:$8 sps:$4 sm:$0xff]  }
   0x2   :  { %716 = vmatprep.subr.bf16.mxu0 %v806_v0  ;;  %720 = vmatprep.mubr.msk.bf16.mxu0 %vm807_vm0, %v806_v0  ;;  %v764_v3 = vld [vmem:[%s1016_s1 + $0x20] ss:$8 sps:$4 sm:$0xff]   ;;  %v765_v4 = vld [vmem:[%s1016_s1 + $0x30] ss:$8 sps:$4 sm:$0xff]  }
   0x3   :  { %689 = vmatpush3.bf16.msra.mxu1 %v762_v1  ;;  %v15_v5 = vld [vmem:[%s1017_s0] sm:$0xff]  ;;  %v767_v20 = vld [vmem:[%s1016_s1 + $0x50] ss:$8 sps:$4 sm:$0xff]  }
   0x4   :  { %690 = vmatprep.subr.bf16.mxu1 %v806_v0  ;;  %v24_v6 = vpack.c.bf16 %v15_v5, %v15_v5  ;;  %v25_v7 = vld [vmem:[%s1018_s2] sm:$0xff]  ;;  %v94_v25 = vld [vmem:[%s1018_s2 + $0x10] sm:$0xff] }
   0x5   :  { %v766_v19 = vld [vmem:[%s1016_s1 + $0x40] ss:$8 sps:$4 sm:$0xff]   ;;  %v119_v32 = vld [vmem:[%s1018_s2 + $0x30] sm:$0xff] }
   0x6   :  { %v95_v27 = vld [vmem:[%s1018_s2 + $0x20] sm:$0xff]  ;;  %v769_v45 = vld [vmem:[%s1016_s1 + $0x70] ss:$8 sps:$4 sm:$0xff]  }
   0x7   :  { %691 = vmatpush3.bf16.msra.mxu1 %v763_v2  ;;  %v768_v44 = vld [vmem:[%s1016_s1 + $0x60] ss:$8 sps:$4 sm:$0xff]   ;;  %v176_v52 = vld [vmem:[%s1018_s2 + $0x50] sm:$0xff] }
   0x8   :  { %692 = vmatprep.subr.bf16.mxu1 %v806_v0  ;;  %v175_v50 = vld [vmem:[%s1018_s2 + $0x40] sm:$0xff] }
   0x9   :  { %v198_v57 = vld [vmem:[%s1018_s2 + $0x60] sm:$0xff] }
   0xb   :  { %693 = vmatpush3.bf16.msra.mxu1 %v764_v3 }
   0xc   :  { %694 = vmatprep.subr.bf16.mxu1 %v806_v0 }
   0xf   :  { %695 = vmatpush3.bf16.msra.mxu1 %v765_v4 }
  0x10   :  { %700 = vmatprep.subr.bf16.mxu1 %v806_v0 }
  0x12   :  { %697 = vmatmul.mubr.msk.bf16.vlgmr.msra.gmra.mrb[0].mxu1 %vm50_vm1, %v24_v6  ;;  %v770_v6 = vld [vmem:[%s1016_s1 + $0x80] ss:$8 sps:$4 sm:$0xff]  }
  0x13   :  { %704 = vmatprep.mubr.msk.bf16.mxu1 %vm807_vm0, %v806_v0  ;;  %701 = vmatpush3.bf16.msra.mxu1 %v766_v19 }
  0x14   :  { %702 = vmatprep.subr.bf16.mxu1 %v806_v0  ;;  %717 = vmatpush3.bf16.msra.mxu0 %v770_v6 }
  0x15   :  { %718 = vmatprep.subr.bf16.mxu0 %v806_v0 }
  0x17   :  { %703 = vmatpush3.bf16.msra.mxu1 %v767_v20 }
  0x18   :  { %708 = vmatprep.subr.bf16.mxu1 %v806_v0 }
  0xe5   :  { %v88_v8 = vpop.f32.mrb[0].mxu1 }
  0xe6   :  { %v89_v9 = vadd.f32 %v88_v8, %v25_v7  ;;  %v698_v10 = vpop.f32.mrb[1].mxu1  ;;  %v771_v7 = vld [vmem:[%s1016_s1 + $0x90] ss:$8 sps:$4 sm:$0xff]   ;;  %v772_v8 = vld [vmem:[%s1016_s1 + $0xa0] ss:$8 sps:$4 sm:$0xff]  }
  0xe7   :  { %v91_v11 = vpop.f32.mrb[2].mxu1  ;;  %719 = vmatpush3.bf16.msra.mxu0 %v771_v7 }
  0xe8   :  { %v699_v12 = vpop.f32.mrb[3].mxu1  ;;  %v97_v13 = vsel %vm96_vm2, %v89_v9, 0.0 }
  0xe9   :  { %98 = vadd.xlane.f32.xlu0 %v97_v13 }
 0x176   :  { %v99_v14 = vpop.xlane.xlu0 %98 }
 0x177   :  { %v101_v15 = vmul.f32 0.03125, %v99_v14  ;;  %v254_v14 = vld [vmem:[%s1018_s2 + $0x70] sm:$0xff] }
 0x179   :  { %v102_v16 = vsub.f32 %v89_v9, %v101_v15  ;;  %v773_v9 = vld [vmem:[%s1016_s1 + $0xb0] ss:$8 sps:$4 sm:$0xff]  }
 0x17b   :  { %v103_v17 = vmul.f32 %v102_v16, %v102_v16 }
 0x17d   :  { %v104_v18 = vsel %vm96_vm2, %v103_v17, 0.0 }
 0x17e   :  { %105 = vadd.xlane.f32.xlu0 %v104_v18 }
 0x20b   :  { %v106_v21 = vpop.xlane.xlu0 %105 }
 0x20c   :  { %v107_v22 = vmul.f32 0.03125, %v106_v21  ;;  %v774_v21 = vld [vmem:[%s1016_s1 + $0xc0] ss:$8 sps:$4 sm:$0xff]  }
 0x20e   :  { %v108_v23 = vadd.f32 1e-05, %v107_v22  ;;  %v775_v22 = vld [vmem:[%s1016_s1 + $0xd0] ss:$8 sps:$4 sm:$0xff]  }
 0x210   :  { %790 = vrsqrt.f32 %v108_v23  ;;  %v277_v23 = vld [vmem:[%s1018_s2 + $0x90] sm:$0xff] }
 0x21a   :  { %v791_v24 = vpop.eup %790 }
 0x21b   :  { %v110_v26 = vmul.f32 %v791_v24, %v102_v16  ;;  %v255_v16 = vld [vmem:[%s1018_s2 + $0x80] sm:$0xff] }
 0x21d   :  { %v111_v28 = vmul.f32 %v110_v26, %v94_v25 }
 0x21f   :  { %v112_v29 = vadd.f32 %v111_v28, %v95_v27 }
 0x221   :  { %v113_v30 = vmax.f32 %v112_v29, 0.0 }
 0x223   :  { %v118_v31 = vpack.c.bf16 %v113_v30, %v113_v30 }
 0x225   :  { %705 = vmatmul.mubr.msk.bf16.vlgmr.msra.gmra.mrb[4].mxu1 %vm96_vm2, %v118_v31  ;;  %v776_v31 = vld [vmem:[%s1016_s1 + $0xe0] ss:$8 sps:$4 sm:$0xff]  }
 0x226   :  { %712 = vmatprep.mubr.msk.bf16.mxu1 %vm807_vm0, %v806_v0  ;;  %709 = vmatpush3.bf16.msra.mxu1 %v768_v44 }
 0x227   :  { %710 = vmatprep.subr.bf16.mxu1 %v806_v0 }
 0x22a   :  { %711 = vmatpush3.bf16.msra.mxu1 %v769_v45  ;;  %v783_v45 = vld [vmem:[%s1016_s1 + $0x110] ss:$8 sps:$4 sm:$0xff]  }
 0x22b   :  { %724 = vmatprep.subr.bf16.mxu1 %v806_v0 }
 0x2f8   :  { %v169_v33 = vpop.f32.mrb[4].mxu1 }
 0x2f9   :  { %v170_v34 = vadd.f32 %v169_v33, %v119_v32  ;;  %v706_v35 = vpop.f32.mrb[5].mxu1  ;;  %v778_v32 = vld [vmem:[%s1016_s1 + $0xe4] ss:$8 sps:$4 sm:$0xff]   ;;  %v781_v33 = vld [vmem:[%s1016_s1 + $0xf4] ss:$8 sps:$4 sm:$0xff]  }
 0x2fa   :  { %v172_v36 = vpop.f32.mrb[6].mxu1  ;;  %442 = vmatprep.subr.bf16.mxu0 %v778_v32  ;;  %v779_v35 = vld [vmem:[%s1016_s1 + $0xf0] ss:$8 sps:$4 sm:$0xff]  }
 0x2fb   :  { %v707_v37 = vpop.f32.mrb[7].mxu1  ;;  %v177_v38 = vsel %vm96_vm2, %v170_v34, 0.0  ;;  %v343_v36 = vld [vmem:[%s1018_s2 + $0xa0] sm:$0xff] }
 0x2fc   :  { %178 = vadd.xlane.f32.xlu1 %v177_v38 }
 0x389   :  { %v179_v39 = vpop.xlane.xlu1 %178 }
 0x38a   :  { %v180_v40 = vmul.f32 0.03125, %v179_v39 }
 0x38c   :  { %v181_v41 = vsub.f32 %v170_v34, %v180_v40  ;;  %v808_v34 = vmov 0  }
 0x38d   :  { %760 = vset.pattern.permute.xlu1 %v808_v34  ;;  %761 = vset.pattern.permute.xlu0 %v808_v34 }
 0x38e   :  { %v182_v42 = vmul.f32 %v181_v41, %v181_v41 }
 0x390   :  { %v183_v43 = vsel %vm96_vm2, %v182_v42, 0.0 }
 0x391   :  { %184 = vadd.xlane.f32.xlu1 %v183_v43  ;;  %v782_v43 = vld [vmem:[%s1016_s1 + $0x100] ss:$8 sps:$4 sm:$0xff]  }
 0x41e   :  { %v185_v46 = vpop.xlane.xlu1 %184 }
 0x41f   :  { %v186_v47 = vmul.f32 0.03125, %v185_v46  ;;  %v784_v46 = vld [vmem:[%s1016_s1 + $0x120] ss:$8 sps:$4 sm:$0xff]  }
 0x421   :  { %v187_v48 = vadd.f32 1e-05, %v186_v47  ;;  %v785_v47 = vld [vmem:[%s1016_s1 + $0x130] ss:$8 sps:$4 sm:$0xff]  }
 0x423   :  { %792 = vrsqrt.f32 %v187_v48  ;;  %v786_v48 = vld [vmem:[%s1016_s1 + $0x140] ss:$8 sps:$4 sm:$0xff]  }
 0x42d   :  { %v793_v49 = vpop.eup %792 }
 0x42e   :  { %v189_v51 = vmul.f32 %v793_v49, %v181_v41  ;;  %v787_v49 = vld [vmem:[%s1016_s1 + $0x150] ss:$8 sps:$4 sm:$0xff]  }
 0x430   :  { %v190_v53 = vmul.f32 %v189_v51, %v175_v50  ;;  %v788_v50 = vld [vmem:[%s1016_s1 + $0x160] ss:$8 sps:$4 sm:$0xff]   ;;  %v789_v51 = vld [vmem:[%s1016_s1 + $0x170] ss:$8 sps:$4 sm:$0xff]  }
 0x432   :  { %v191_v54 = vadd.f32 %v190_v53, %v176_v52  ;;  %v417_v52 = vld [vmem:[%s1018_s2 + $0xb0] sm:$0xff] }
 0x434   :  { %v192_v55 = vmax.f32 %v191_v54, 0.0 }
 0x436   :  { %v197_v56 = vpack.c.bf16 %v192_v55, %v192_v55 }
 0x438   :  { %713 = vmatmul.mubr.msk.bf16.vlgmr.msra.gmra.mrb[8].mxu1 %vm96_vm2, %v197_v56 }
 0x439   :  { %732 = vmatprep.mubr.msk.bf16.mxu1 %vm807_vm0, %v806_v0  ;;  %725 = vmatpush3.bf16.msra.mxu1 %v772_v8 }
 0x43a   :  { %726 = vmatprep.subr.bf16.mxu1 %v806_v0 }
 0x43d   :  { %727 = vmatpush3.bf16.msra.mxu1 %v773_v9 }
 0x43e   :  { %728 = vmatprep.subr.bf16.mxu1 %v806_v0 }
 0x441   :  { %729 = vmatpush3.bf16.msra.mxu1 %v774_v21 }
 0x442   :  { %730 = vmatprep.subr.bf16.mxu1 %v806_v0 }
 0x445   :  { %731 = vmatpush3.bf16.msra.mxu1 %v775_v22 }
 0x50b   :  { %v248_v58 = vpop.f32.mrb[8].mxu1 }
 0x50c   :  { %v249_v59 = vadd.f32 %v248_v58, %v198_v57  ;;  %v714_v60 = vpop.f32.mrb[9].mxu1 }
 0x50d   :  { %v251_v61 = vpop.f32.mrb[10].mxu1 }
 0x50e   :  { %v715_v62 = vpop.f32.mrb[11].mxu1  ;;  %v256_v63 = vsel %vm96_vm2, %v249_v59, 0.0 }
 0x50f   :  { %257 = vadd.xlane.f32.xlu0 %v256_v63  ;;  %v507_v62 = vld [vmem:[%s1018_s2 + $0xc0] sm:$0xff] }
 0x59c   :  { %v258_v1 = vpop.xlane.xlu0 %257 }
 0x59d   :  { %v259_v2 = vmul.f32 0.03125, %v258_v1 }
 0x59f   :  { %v260_v3 = vsub.f32 %v249_v59, %v259_v2 }
 0x5a1   :  { %v261_v4 = vmul.f32 %v260_v3, %v260_v3 }
 0x5a3   :  { %v262_v5 = vsel %vm96_vm2, %v261_v4, 0.0  ;;  %v597_v4 = vld [vmem:[%s1018_s2 + $0xd0] sm:$0xff] }
 0x5a4   :  { %263 = vadd.xlane.f32.xlu1 %v262_v5 }
 0x631   :  { %v264_v10 = vpop.xlane.xlu1 %263 }
 0x632   :  { %v265_v11 = vmul.f32 0.03125, %v264_v10 }
 0x634   :  { %v266_v12 = vadd.f32 1e-05, %v265_v11 }
 0x636   :  { %794 = vrsqrt.f32 %v266_v12  ;;  %v602_v12 = vld [vmem:[%s1018_s2 + $0xe0] sm:$0xff] }
 0x640   :  { %v795_v13 = vpop.eup %794 }
 0x641   :  { %v268_v15 = vmul.f32 %v795_v13, %v260_v3 }
 0x643   :  { %v269_v17 = vmul.f32 %v268_v15, %v254_v14 }
 0x645   :  { %v270_v18 = vadd.f32 %v269_v17, %v255_v16 }
 0x647   :  { %v271_v19 = vmax.f32 %v270_v18, 0.0 }
 0x649   :  { %v276_v20 = vpack.c.bf16 %v271_v19, %v271_v19 }
 0x64b   :  { %721 = vmatmul.mubr.msk.bf16.vlgmr.msra.gmra.mrb[0].mxu0 %vm96_vm2, %v276_v20 }
 0x64c   :  { %474 = vmatprep.mubr.bf16.mxu0 %v808_v34  ;;  %443 = vmatpush1.bf16.msra.mxu0 %v776_v31 }
 0x64d   :  { %444 = vmatprep.subr.bf16.mxu0 %v781_v33 }
 0x650   :  { %445 = vmatpush1.bf16.msra.mxu0 %v779_v35 }
 0x651   :  { %736 = vmatprep.subr.bf16.mxu0 %v806_v0 }
 0x71e   :  { %v327_v24 = vpop.f32.mrb[0].mxu0 }
 0x71f   :  { %v328_v25 = vadd.f32 %v327_v24, %v277_v23  ;;  %v722_v26 = vpop.f32.mrb[1].mxu0 }
 0x720   :  { %v330_v27 = vpop.f32.mrb[2].mxu0 }
 0x721   :  { %v333_v28 = vmax.f32 %v328_v25, 0.0  ;;  %v723_v29 = vpop.f32.mrb[3].mxu0 }
 0x723   :  { %v342_v30 = vpack.c.bf16 %v333_v28, %v333_v28 }
 0x725   :  { %733 = vmatmul.mubr.msk.bf16.vlgmr.msra.gmra.mrb[12].mxu1 %vm50_vm1, %v342_v30 }
 0x7f8   :  { %v405_v37 = vpop.f32.mrb[12].mxu1 }
 0x7f9   :  { %v406_v38 = vadd.f32 %v405_v37, %v343_v36  ;;  %v734_v39 = vpop.f32.mrb[13].mxu1 }
 0x7fa   :  { %v408_v40 = vpop.f32.mrb[14].mxu1 }
 0x7fb   :  { %796 = vtanh.f32 %v406_v38  ;;  %v735_v41 = vpop.f32.mrb[15].mxu1 }
 0x805   :  { %v956_v42 = vpop.eup %796 }
 0x806   :  { %v416_v44 = vpack.c.bf16 %v956_v42, %v956_v42 }
 0x808   :  { %649 = vmatmul.mubr.msk.bf16.vlgmr.msra.gmra.mrb[4].mxu0 %vm96_vm2, %v416_v44 }
 0x809   :  { %737 = vmatpush3.bf16.msra.mxu0 %v782_v43  ;;  %752 = vmatprep.mubr.msk.bf16.mxu0 %vm807_vm0, %v806_v0 }
 0x80a   :  { %738 = vmatprep.subr.bf16.mxu0 %v806_v0 }
 0x80d   :  { %739 = vmatpush3.bf16.msra.mxu0 %v783_v45 }
 0x80e   :  { %740 = vmatprep.subr.bf16.mxu0 %v806_v0 }
 0x811   :  { %741 = vmatpush3.bf16.msra.mxu0 %v784_v46 }
 0x812   :  { %742 = vmatprep.subr.bf16.mxu0 %v806_v0 }
 0x815   :  { %743 = vmatpush3.bf16.msra.mxu0 %v785_v47 }
 0x816   :  { %744 = vmatprep.subr.bf16.mxu0 %v806_v0 }
 0x819   :  { %745 = vmatpush3.bf16.msra.mxu0 %v786_v48 }
 0x81a   :  { %746 = vmatprep.subr.bf16.mxu0 %v806_v0 }
 0x81d   :  { %747 = vmatpush3.bf16.msra.mxu0 %v787_v49 }
 0x81e   :  { %748 = vmatprep.subr.bf16.mxu0 %v806_v0 }
 0x821   :  { %749 = vmatpush3.bf16.msra.mxu0 %v788_v50 }
 0x822   :  { %750 = vmatprep.subr.bf16.mxu0 %v806_v0  ;;  %v418_v0 = vld [vmem:[%s1018_s2 + $0xb8] sm:$0xff] }
 0x825   :  { %751 = vmatpush3.bf16.msra.mxu0 %v789_v51 }
 0x8db   :  { %v476_v53 = vpop.f32.mrb[4].mxu0 }
 0x8dc   :  { %v477_v54 = vadd.f32 %v476_v53, %v417_v52  ;;  %v478_v55 = vpop.f32.mrb[5].mxu0 }
 0x8dd   :  { %v480_v56 = vpop.f32.mrb[6].mxu0  ;;  %v479_v60 = vadd.f32 %v478_v55, %v418_v0 }
 0x8de   :  { %v483_v57 = vmax.f32 %v477_v54, 0.0  ;;  %v481_v58 = vpop.f32.mrb[7].mxu0 }
 0x8df   :  { %v650_v61 = vmul.f32 -1.442695, %v479_v60 }
 0x8e0   :  { %v506_v59 = vpack.c.bf16 %v483_v57, %v483_v57 }
 0x8e1   :  { %798 = vpow2.f32 %v650_v61 }
 0x8e2   :  { %753 = vmatmul.mubr.bf16.vlgmr.msra.gmra.mrb[8].mxu0 %v506_v59 }
 0x8eb   :  { %v799_v9 = vpop.eup %798 }
 0x8ec   :  { %v487_v10 = vadd.f32 1.0, %v799_v9 }
 0x8ee   :  { %800 = vrcp.f32 %v487_v10 }
 0x8f8   :  { %v801_v11 = vpop.eup %800 }
 0x9b5   :  { %v590_v63 = vpop.f32.mrb[8].mxu0 }
 0x9b6   :  { %v591_v1 = vadd.f32 %v590_v63, %v507_v62  ;;  %v754_v2 = vpop.f32.mrb[9].mxu0 }
 0x9b7   :  { %v593_v3 = vpop.f32.mrb[10].mxu0 }
 0x9b8   :  { %v596_v5 = vmax.f32 %v591_v1, 0.0  ;;  %v755_v6 = vpop.f32.mrb[11].mxu0 }
 0x9ba   :  { %v598_v7 = vmul.f32 %v597_v4, %v596_v5 }
 0x9bc   :  { %v599_v8 = vsel %vm50_vm1, %v598_v7, 0.0 }
 0x9bd   :  { %600 = vadd.xlane.f32.xlu0 %v599_v8 }
 0x9d3   :  { %616 = vrot.lane.b32.xlu0 %v801_v11, %s809_s11 }
 0xa4a   :  { %v601_v13 = vpop.xlane.xlu0 %600 }
 0xa4b   :  { %v603_v14 = vadd.f32 %v602_v12, %v601_v13 }
 0xa4d   :  { %v659_v15 = vmul.f32 -1.442695, %v603_v14 }
 0xa4e   :  { %v617_v19 = vpop.permute.xlu0 %616 }
 0xa4f   :  { %802 = vpow2.f32 %v659_v15  ;;  %v619_v20 = vsel %vm96_vm2, %v956_v42, %v617_v19 }
 0xa59   :  { %v803_v16 = vpop.eup %802 }
 0xa5a   :  { %v607_v17 = vadd.f32 1.0, %v803_v16 }
 0xa5c   :  { %804 = vrcp.f32 %v607_v17 }
 0xa66   :  { %v805_v18 = vpop.eup %804 }
 0xa67   :  { %612 = vperm.xlu1 %760, %v805_v18  }
 0xae6   :  { %v613_v21 = vpop.permute.xlu1 %612 }
 0xae7   :  { %v620_v22 = vsel %vm50_vm1, %v619_v20, %v613_v21 }
 0xae8   :  { %621 = vst [vmem:[%s1019_s3] sm:$0xff] %v620_v22 }

</bundles_post_ra>
